<compile_context>
chip_gen: v7x
topology: tpu7x:2x2x1
jax: 0.10.0
libtpu: 0.0.40
codegen_flags: <defaults>
</compile_context>

<pallas_src>
import jax
import jax.numpy as jnp
from jax.experimental import pallas as pl
from jax.experimental.pallas import tpu as pltpu


def _cdiv(a, b):
    return -(-a // b)


def _round_up(a, m):
    return _cdiv(a, m) * m


def _tpu_budget():
    """Returns (target_tile_bytes, t_row_bytes_cap, vmem_cap_bytes).

    Generation-aware: large 128 MiB-VMEM parts (v5e/v6e) get 8 MiB per buffer
    and 8 KiB of T per row; v7x (64 MiB VMEM per TC) or unknown hardware stays
    conservative at 4 MiB / 4 KiB so the double-buffered footprint fits the
    32 MiB default scoped VMEM with headroom.
    """
    vmem_capacity = None
    try:
        vmem_capacity = getattr(pltpu.get_tpu_info(), "vmem_capacity_bytes", None)
    except Exception:
        vmem_capacity = None
    if vmem_capacity is not None and vmem_capacity >= 100 * 1024 * 1024:
        return 8 * 1024 * 1024, 8192, 64 * 1024 * 1024
    return 4 * 1024 * 1024, 4096, 32 * 1024 * 1024


def _chomp_kernel(x_ref, o_ref):
    # x_ref : (rows_block, in_t_block)   VMEM tile
    # o_ref : (rows_block, out_t_block)  VMEM tile, out_t_block <= in_t_block
    # Zero-offset prefix slice: output column k == input column k, so this is
    # a pure streaming copy (static slice only when the block widths differ).
    o_ref[...] = x_ref[:, : o_ref.shape[-1]]


def chomp1d(x: jax.Array, chomp_size: int) -> jax.Array:
    """Drop the last `chomp_size` steps of the time axis: x[:, :, :-chomp_size]."""
    assert chomp_size > 0, "chomp_size must be positive (matches PyTorch x[:, :, :-c])"
    n, c, t = x.shape
    t_out = t - chomp_size
    assert t_out > 0, "chomp_size must be smaller than the time dimension"

    rows = n * c
    itemsize = jnp.dtype(x.dtype).itemsize
    sub = {4: 8, 2: 16, 1: 32}.get(itemsize, 8)  # packed sublane multiple

    target_tile_bytes, t_row_bytes_cap, vmem_cap = _tpu_budget()

    # ---- T (lane) axis ------------------------------------------------------
    if t_out >= 128:
        # Lane-dense 128-multiple blocks; only the last block has a ragged tail.
        t_cap = max(128, ((t_row_bytes_cap // itemsize) // 128) * 128)
        out_t_block = min(t_cap, (t_out // 128) * 128)
        in_t_block = out_t_block
    else:
        # Tiny time axis: one T block.  Input block is the full T (legal: equal
        # to array extent) or exactly 128 lanes; output block is the full t_out.
        out_t_block = t_out
        in_t_block = t if t < 128 else 128

    # ---- rows (sublane) axis: byte budget + 2-TC balanced blocks ------------
    rows_budget = max(sub, target_tile_bytes // (in_t_block * itemsize))
    if rows <= rows_budget:
        rows_block = rows  # full extent -> always a legal block
    else:
        n_row_blocks = _cdiv(rows, rows_budget)
        rows_block = min(rows, _round_up(_cdiv(rows, n_row_blocks), sub))

    grid = (_cdiv(rows, rows_block), _cdiv(t_out, out_t_block))

    # ---- explicit VMEM budget: double-buffered in + out, ~2x headroom -------
    tile_bytes = rows_block * (in_t_block + out_t_block) * itemsize
    vmem_limit = int(min(vmem_cap, max(4 * 1024 * 1024, 4 * tile_bytes)))

    x2 = x.reshape(rows, t)  # free: contiguous (N, C, T) -> (N*C, T)

    out2 = pl.pallas_call(
        _chomp_kernel,
        out_shape=jax.ShapeDtypeStruct((rows, t_out), x.dtype),
        grid=grid,
        in_specs=[pl.BlockSpec((rows_block, in_t_block), lambda i, j: (i, j))],
        out_specs=pl.BlockSpec((rows_block, out_t_block), lambda i, j: (i, j)),
        compiler_params=pltpu.CompilerParams(
            dimension_semantics=("parallel", "parallel"),
            vmem_limit_bytes=vmem_limit,
        ),
        cost_estimate=pl.CostEstimate(
            flops=0,
            transcendentals=0,
            bytes_accessed=2 * rows * t_out * itemsize,  # read prefix + write output
        ),
    )(x2)

    return out2.reshape(n, c, t_out)


if __name__ == "__main__":
    key = jax.random.PRNGKey(0)

    # (shape NCT, chomp_size, dtype) — exercises every tiling path:
    #   tiny T (< 128), tiled T with ragged tail, wide rows, bf16 byte-budget
    #   tiling, and a larger case that hits the balanced multi-row-block path.
    cases = [
        ((2, 4, 16), 3, jnp.float32),
        ((2, 8, 300), 11, jnp.float32),
        ((2, 321, 400), 7, jnp.float32),
        ((2, 16, 200), 5, jnp.bfloat16),
        ((8, 512, 1100), 100, jnp.float32),
    ]

    for shape, chomp, dtype in cases:
        key, sub = jax.random.split(key)
        x = jax.random.normal(sub, shape, dtype=dtype)

        out = jax.block_until_ready(chomp1d(x, chomp))

        # Reference: plain JAX slice == PyTorch x[:, :, :-chomp_size]
        ref = x[:, :, :-chomp]
        assert out.shape == ref.shape, (out.shape, ref.shape)
        assert out.dtype == x.dtype
        assert jnp.array_equal(out, ref), f"mismatch for shape={shape}, chomp={chomp}"

    print("KERNEL_OK")
</pallas_src>

<mosaic_0001>
module attributes {stable_mosaic.version = 11 : i64} {
  func.func @_chomp_kernel(%arg0: i32, %arg1: i32, %arg2: memref<8x16xf32, #tpu.memory_space<vmem>>, %arg3: memref<8x13xf32, #tpu.memory_space<vmem>>) attributes {dimension_semantics = [#tpu.dimension_semantics<parallel>, #tpu.dimension_semantics<parallel>], iteration_bounds = array<i64: 1, 1>, scalar_prefetch = 0 : i64, scratch_operands = 0 : i64, tpu.core_type = #tpu.core_type<tc>, window_params = [{transform_indices = @transform_0, window_bounds = array<i64: 8, 16>}, {transform_indices = @transform_1, window_bounds = array<i64: 8, 13>}]} {
    %c0 = arith.constant 0 : index
    %c0_0 = arith.constant 0 : index
    %0 = vector.load %arg2[%c0, %c0_0] : memref<8x16xf32, #tpu.memory_space<vmem>>, vector<8x13xf32>
    %c0_1 = arith.constant 0 : index
    %c0_2 = arith.constant 0 : index
    %1 = vector.load %arg3[%c0_1, %c0_2] : memref<8x13xf32, #tpu.memory_space<vmem>>, vector<8x13xf32>
    tpu.vector_store %arg3[%c0_1, %c0_2], %0 {strides = array<i32>} : memref<8x13xf32, #tpu.memory_space<vmem>>, vector<8x13xf32>,
    return
  }
  func.func @transform_0(%arg0: i32, %arg1: i32) -> (i32, i32) {
    %c0_i32 = arith.constant 0 : i32
    return %arg0, %arg1 : i32, i32
  }
  func.func @transform_1(%arg0: i32, %arg1: i32) -> (i32, i32) {
    %c0_i32 = arith.constant 0 : i32
    return %arg0, %arg1 : i32, i32
  }
}

</mosaic_0001>

<bundles_post_ra>
// kernel: tpu_custom_call.1
= control target key start
LH: loop header
LB: loop body
LE: loop exit
PB: predicated region body
PF: predicated region fallthrough
CT: control target
= control target key end

     0   :  { %6 = vsyncpa [#allocation3], 0  ;;  %s125_s0 = inlined_call_operand.hbm [shape: f32[8,16], index: 0, kind: input, shape index: {}]   ;;  %s126_s1 = inlined_call_operand.hbm [shape: f32[8,13], index: 1, kind: output, shape index: {}]  }
   0x1   :  { %7 = vsyncpa [#allocation4], 0  ;;  %s89_s6 = smov [#allocation2]   ;;  %s41_s10 = scalar_lea.hbm %s125_s0, 128 }
   0x2   :  { %s14_s7 = sshll.u32 %s89_s6, 4  ;;  %p42_p0 = scmp.ne.s32.totalorder %s125_s0, %s41_s10  ;;  %s15_s7 = int_to_ptr.vmem [resolvable:$true] %s14_s7 }
   0x3   :  { %p45_p1 = scmp.lt.u32.totalorder %s41_s10, %s125_s0 }
   0x5   :  { %p47_p2 = pnand %p45_p1, %p42_p0 }
   0x7   :  { %50 = shalt.err (!%p47_p2)
}
   0x8   :  { %s51_s15 = scalar_lea.vmem %s15_s7, 128  ;;  %p56_p4 = scmp.lt.s32.totalorder %s15_s7, %s15_s7 }
   0x9   :  { %p52_p3 = scmp.ne.s32.totalorder %s15_s7, %s51_s15  ;;  %p57_p5 = scmp.lt.s32.totalorder %s51_s15, %s51_s15 }
   0xb   :  { %p58_p6 = por %p57_p5, %p56_p4 }
   0xd   :  { %p59_p7 = pnand %p58_p6, %p52_p3 }
   0xf   :  { %62 = shalt.err (!%p59_p7)
}
  0x10   :  { %17 = dma.hbm_to_vmem [thread:$0]  %s125_s0, 128, %s15_s7, [#allocation3]  }
  0x11   :  { %85 = dma.done.wait [#allocation3], 128  }
  0x12   :  { %86 = vsyncadd [#allocation3], 4294967168  ;;  %s90_s18 = smov [#allocation5]   ;;  %vm22_vm0 = vcmask 105472   ;;  %v21_v0 = vld [vmem:[#allocation2] sm:$0xff] }
  0x13   :  { %s30_s19 = sshll.u32 %s90_s18, 4  ;;  %23 = vst.msk [vmem:[#allocation5] sm:$0xff] %vm22_vm0, %v21_v0  ;;  %s31_s19 = int_to_ptr.vmem [resolvable:$true] %s30_s19 }
  0x14   :  { %s63_s20 = scalar_lea.vmem %s31_s19, 128  ;;  %p68_p9 = scmp.lt.s32.totalorder %s31_s19, %s31_s19 }
  0x15   :  { %p64_p8 = scmp.ne.s32.totalorder %s31_s19, %s63_s20  ;;  %p69_p10 = scmp.lt.s32.totalorder %s63_s20, %s63_s20 }
  0x17   :  { %p70_p11 = por %p69_p10, %p68_p9 }
  0x19   :  { %p71_p12 = pnand %p70_p11, %p64_p8 }
  0x1b   :  { %74 = shalt.err (!%p71_p12)
}
  0x1c   :  { %s75_s23 = scalar_lea.hbm %s126_s1, 128 }
  0x1d   :  { %p76_p13 = scmp.ne.s32.totalorder %s126_s1, %s75_s23  ;;  %p79_p0 = scmp.lt.u32.totalorder %s75_s23, %s126_s1 }
  0x1f   :  { %p81_p1 = pnand %p79_p0, %p76_p13 }
  0x21   :  { %84 = shalt.err (!%p81_p1)
}
  0x22   :  { %33 = dma.vmem_to_hbm [thread:$0]  %s31_s19, 128, %s126_s1, [#allocation4]  }
  0x23   :  { %87 = dma.done.wait [#allocation4], 128  }
  0x24   :  { %88 = vsyncadd [#allocation4], 4294967168 }
  0x25   :  { %37 = vsyncpa [#allocation3], 1 }
  0x26   :  { %38 = vsyncpa [#allocation4], 1 }

</bundles_post_ra>
